<compile_context>
chip_gen: v7x
topology: tpu7x:2x2x1
jax: 0.10.0
libtpu: 0.0.40
codegen_flags: <defaults>
</compile_context>

<pallas_src>
import functools

import jax
import jax.numpy as jnp
from jax.experimental import pallas as pl
from jax.experimental.pallas import tpu as pltpu


def _copy_kernel(x_ref, o_ref):
    # Straight VMEM tile copy; DMA in/out is pipelined by the BlockSpec machinery.
    o_ref[...] = x_ref[...]


# Lane widths to try (all multiples of 128 -> unmasked full-width stores).
_LANE_CANDIDATES = (4096, 2048, 1024, 512, 256, 128)

# Below this size the Pallas launch overhead dwarfs the copy: return x.
_SMALL_FAST_PATH_BYTES = 1 << 20  # 1 MiB


@functools.lru_cache(maxsize=None)
def _per_buffer_bytes() -> int:
    """Generation-aware per-buffer VMEM budget (4 live buffers: 2 in + 2 out)."""
    try:
        kind = jax.devices()[0].device_kind.lower()
    except Exception:  # pragma: no cover - defensive; fall back to safe default
        return 4 << 20
    if "v5 lite" in kind or "v5e" in kind or "v5litepod" in kind:
        return 3 << 20   # 4 x 3 MiB = 12 MiB, inside v5e's 16 MiB default scoped VMEM
    if "v6" in kind or "trillium" in kind:
        return 6 << 20   # 4 x 6 MiB = 24 MiB, v6e has headroom; big tiles ~85% roofline
    # v7x (only 64 MiB physical VMEM) and anything unknown: keep footprint modest.
    return 4 << 20


def _choose_layout(total: int):
    """Pick a lane-dense (rows, lanes) view of the flat tensor, or None."""
    divisible = [lanes for lanes in _LANE_CANDIDATES if total % lanes == 0]
    if not divisible:
        return None
    # Prefer the widest lane dim that still leaves enough rows to tile/parallelize.
    for lanes in divisible:
        if total // lanes >= 128:
            return total // lanes, lanes
    # Tiny tensor: take the narrowest (still 128-multiple) lane width -> most rows.
    lanes = divisible[-1]
    return total // lanes, lanes


def _choose_tm(rows: int, lanes: int, dtype_bytes: int, per_buffer_bytes: int) -> int:
    """Row-tile size: multiple of 32 sublanes (covers bf16/int8/fp8 packing),
    capped by the VMEM budget, with >= 2 (ideally >= 4) grid steps and a
    preference for divisors of `rows` so no block needs masked stores."""
    if rows <= 32:
        return rows  # single full-extent block (layout-legal as full dim)
    max_rows = max(32, per_buffer_bytes // max(1, lanes * dtype_bytes))
    min_blocks = 4 if rows >= 128 else 2
    cap = min(max_rows, max(32, rows // min_blocks))
    cap = max(32, (cap // 32) * 32)
    # Prefer a divisor of rows -> every block is full width, no ragged tail.
    for tm in range(cap, 31, -32):
        if rows % tm == 0:
            return tm
    # TODO(synk): ragged last block relies on Pallas masking; verified for f32,
    # sub-32-bit dtypes with non-divisor tm keep correctness via masked stores.
    return cap


@jax.jit
def _pallas_identity_copy(x: jax.Array) -> jax.Array:
    """Materialize a bit-exact copy of x via a tiled, pipelined Pallas kernel."""
    orig_shape = x.shape
    total = x.size
    dtype_bytes = jnp.dtype(x.dtype).itemsize

    layout = _choose_layout(total)
    if layout is None:
        # Awkward shape (no 128-multiple factorization): identity needs no copy.
        return x
    rows, lanes = layout

    per_buf = _per_buffer_bytes()
    tm = _choose_tm(rows, lanes, dtype_bytes, per_buf)

    x2 = x.reshape(rows, lanes)
    out2 = pl.pallas_call(
        _copy_kernel,
        out_shape=jax.ShapeDtypeStruct((rows, lanes), x2.dtype),
        grid=(pl.cdiv(rows, tm),),
        in_specs=[pl.BlockSpec((tm, lanes), lambda i: (i, 0))],
        out_specs=pl.BlockSpec((tm, lanes), lambda i: (i, 0)),
        compiler_params=pltpu.CompilerParams(
            dimension_semantics=("parallel",),
            # 2 in + 2 out double-buffered tiles + headroom.
            vmem_limit_bytes=4 * per_buf + (8 << 20),
        ),
        cost_estimate=pl.CostEstimate(
            flops=0,
            transcendentals=0,
            bytes_accessed=2 * total * dtype_bytes,
        ),
    )(x2)
    return out2.reshape(orig_shape)


def your_model_forward(x: jax.Array, *, force_kernel: bool = False) -> jax.Array:
    """Pallas equivalent of YourModel.forward: returns x unchanged.

    Default path for the identity is zero-cost (return x). `force_kernel=True`
    exercises the Pallas streaming-copy kernel explicitly.
    """
    if x.size == 0:
        return x
    nbytes = x.size * jnp.dtype(x.dtype).itemsize
    if not force_kernel and nbytes < _SMALL_FAST_PATH_BYTES:
        # Identity fast path: no HBM read/write at all.
        return x
    return _pallas_identity_copy(x)


if __name__ == "__main__":
    k0, k1 = jax.random.split(jax.random.PRNGKey(0))

    # Module-sized example (NCHW), forced through the Pallas copy kernel so the
    # kernel actually compiles and runs on TPU.
    x_small = jax.random.normal(k0, (2, 4, 16, 16), dtype=jnp.float32)
    y_small = your_model_forward(x_small, force_kernel=True)
    jax.block_until_ready(y_small)
    assert y_small.shape == x_small.shape and y_small.dtype == x_small.dtype
    assert bool(jnp.all(y_small == x_small))

    # Default small-tensor path: zero-copy identity.
    y_fast = your_model_forward(x_small)
    assert y_fast.shape == x_small.shape and bool(jnp.all(y_fast == x_small))

    # Medium tensor (4 MiB) exercises the tiled, multi-block pipelined path
    # (lane-dense view, >= 4 parallel grid steps, generation-aware tile size).
    x_med = jax.random.normal(k1, (512, 2048), dtype=jnp.float32)
    y_med = your_model_forward(x_med)
    jax.block_until_ready(y_med)
    assert y_med.shape == x_med.shape and y_med.dtype == x_med.dtype
    assert bool(jnp.all(y_med == x_med))

    print("KERNEL_OK")
</pallas_src>

<mosaic_0001>
module attributes {stable_mosaic.version = 11 : i64} {
  func.func @_copy_kernel(%arg0: i32, %arg1: memref<16x128xf32, #tpu.memory_space<vmem>>, %arg2: memref<16x128xf32, #tpu.memory_space<vmem>>) attributes {dimension_semantics = [#tpu.dimension_semantics<parallel>], iteration_bounds = array<i64: 1>, scalar_prefetch = 0 : i64, scratch_operands = 0 : i64, tpu.core_type = #tpu.core_type<tc>, window_params = [{transform_indices = @transform_0, window_bounds = array<i64: 16, 128>}, {transform_indices = @transform_1, window_bounds = array<i64: 16, 128>}]} {
    %c0 = arith.constant 0 : index
    %c0_0 = arith.constant 0 : index
    %0 = vector.load %arg1[%c0, %c0_0] : memref<16x128xf32, #tpu.memory_space<vmem>>, vector<16x128xf32>
    %c0_1 = arith.constant 0 : index
    %c0_2 = arith.constant 0 : index
    %1 = vector.load %arg2[%c0_1, %c0_2] : memref<16x128xf32, #tpu.memory_space<vmem>>, vector<16x128xf32>
    tpu.vector_store %arg2[%c0_1, %c0_2], %0 {strides = array<i32>} : memref<16x128xf32, #tpu.memory_space<vmem>>, vector<16x128xf32>,
    return
  }
  func.func @transform_0(%arg0: i32) -> (i32, i32) {
    %c0_i32 = arith.constant 0 : i32
    %c0_i32_0 = arith.constant 0 : i32
    return %arg0, %c0_i32 : i32, i32
  }
  func.func @transform_1(%arg0: i32) -> (i32, i32) {
    %c0_i32 = arith.constant 0 : i32
    %c0_i32_0 = arith.constant 0 : i32
    return %arg0, %c0_i32 : i32, i32
  }
}

</mosaic_0001>

<bundles_post_ra>
// kernel: _pallas_identity_copy.1
= control target key start
LH: loop header
LB: loop body
LE: loop exit
PB: predicated region body
PF: predicated region fallthrough
CT: control target
= control target key end

     0   :  { %s38_s0 = inlined_call_operand.vmem [shape: f32[16,128], index: 0, kind: input, shape index: {}]   ;;  %s39_s1 = inlined_call_operand.vmem [shape: f32[16,128], index: 1, kind: output, shape index: {}]  }
   0x1   :  { %v8_v0 = vld [vmem:[%s38_s0] sm:$0xff]  ;;  %v9_v1 = vld [vmem:[%s38_s0 + $0x8] sm:$0xff] }
   0x2   :  { %10 = vst [vmem:[%s39_s1] sm:$0xff] %v8_v0  ;;  %11 = vst [vmem:[%s39_s1 + $0x8] sm:$0xff] %v9_v1 }

</bundles_post_ra>
